<compile_context>
chip_gen: v7x
topology: tpu7x:2x2x1
jax: 0.10.0
libtpu: 0.0.40
codegen_flags: <defaults>
</compile_context>

<pallas_src>
import enum
import math
from functools import partial

import numpy as np

import jax
import jax.numpy as jnp
from jax.experimental import pallas as pl
from jax.experimental.pallas import tpu as pltpu


# ----------------------------------------------------------------------------
# Enums the original module depends on (Design / Action).
# ----------------------------------------------------------------------------
class Design(enum.Enum):
    INFANTRY = 0
    CAVALRY = 1
    ARTILLERY = 2


class Action(enum.Enum):
    CHOOSE_ATTACK_TARGET = 0
    CHOOSE_ATTACK_BASE = 1
    CHOOSE_ATTACK_ARMIES = 2
    PLACE = 3
    CLAIM = 4
    CAPTURE = 5
    DEFEND = 6
    CHOOSE_FORTIFY_TARGET = 7
    CHOOSE_FORTIFY_SOURCE = 8
    CHOOSE_FORTIFY_ARMIES = 9
    CARDS = 10


MAXIMUM_POTENTIAL_CARDS = 9

# Matmul input dtype.  float32 stays closest to the f64 PyTorch reference;
# switch to jnp.bfloat16 on v6e/v7x for large-batch throughput (MXU native).
_MATMUL_INPUT_DTYPE = jnp.float32


def _pad_to(n: int, m: int) -> int:
    return ((n + m - 1) // m) * m


# ----------------------------------------------------------------------------
# Head layout (order defines lane packing of the fused head matrix).
# ----------------------------------------------------------------------------
def _head_defs(territories: int):
    return [
        ("attack_head_target", territories + 1, "softmax"),
        ("attack_head_base", territories, "softmax"),
        ("attack_head_armies", 3, "softmax"),
        ("placement_head_territory", territories, "softmax"),
        ("placement_head_armies", 1, "sigmoid"),
        ("claim_head", territories, "softmax"),
        ("capture_head", 1, "sigmoid"),
        ("defend_head", 2, "softmax"),
        ("fortify_head_source", territories, "softmax"),
        ("fortify_head_destination", territories + 1, "softmax"),
        ("fortify_head_armies", 1, "sigmoid"),
        ("card_choice_head", 1, "sigmoid"),
    ]


_ACTION_TO_HEADS = {
    Action.CHOOSE_ATTACK_TARGET: ("attack_head_target",),
    Action.CHOOSE_ATTACK_BASE: ("attack_head_base",),
    Action.CHOOSE_ATTACK_ARMIES: ("attack_head_armies",),
    Action.PLACE: ("placement_head_territory", "placement_head_armies"),
    Action.CLAIM: ("claim_head",),
    Action.CAPTURE: ("capture_head",),
    Action.DEFEND: ("defend_head",),
    Action.CHOOSE_FORTIFY_TARGET: ("fortify_head_destination",),
    Action.CHOOSE_FORTIFY_SOURCE: ("fortify_head_source",),
    Action.CHOOSE_FORTIFY_ARMIES: ("fortify_head_armies",),
    Action.CARDS: ("card_choice_head",),
}


# ----------------------------------------------------------------------------
# Fused Pallas kernel: hidden stack + packed heads + per-lane activation.
# Defined once at module scope (no per-call closure construction).
# ----------------------------------------------------------------------------
def _risknet_fused_kernel(x_ref, w1_ref, b1_ref, w2_ref, b2_ref, wh_ref, bh_ref,
                          segp_ref, smax_ref, sig_ref, o_ref):
    mm = _MATMUL_INPUT_DTYPE

    x = x_ref[...].astype(mm)
    h1 = jnp.tanh(
        jnp.dot(x, w1_ref[...].astype(mm), preferred_element_type=jnp.float32)
        + b1_ref[...])
    h2 = jnp.tanh(
        jnp.dot(h1.astype(mm), w2_ref[...].astype(mm),
                preferred_element_type=jnp.float32) + b2_ref[...])
    logits = jnp.dot(h2.astype(mm), wh_ref[...].astype(mm),
                     preferred_element_type=jnp.float32) + bh_ref[...]

    smax_mask = smax_ref[...]     # (1, OUT_PAD) 1.0 on softmax lanes
    sig_mask = sig_ref[...]       # (1, OUT_PAD) 1.0 on sigmoid lanes
    neg = jnp.float32(-1e30)

    # Segmented softmax over the packed head lanes (padded lanes excluded).
    # Shift by the ROW-wise max over all softmax lanes: softmax is shift
    # invariant per segment, so sharing the shift is mathematically exact;
    # logits are bounded (~sqrt(hidden)) so no denominator underflow.
    m = jnp.max(jnp.where(smax_mask > 0, logits, neg), axis=-1, keepdims=True)
    shifted = jnp.where(smax_mask > 0, logits - m, neg)
    e = jnp.exp(shifted)          # exactly 0 off the softmax lanes
    # Per-segment denominator broadcast back onto lanes with ONE
    # block-diagonal (OUT_PAD, OUT_PAD) matmul.
    denom = jnp.dot(e, segp_ref[...], preferred_element_type=jnp.float32)
    inv = pl.reciprocal(jnp.where(denom > 0, denom, 1.0), approx=True)
    smax_val = e * inv

    # Numerically stable sigmoid (tanh form, EUP slot).
    sig_val = 0.5 * (jnp.tanh(0.5 * logits) + 1.0)

    o_ref[...] = smax_val + sig_mask * sig_val


@partial(jax.jit, static_argnames=("tile_b",))
def _slab_forward(packed, x_pad, *, tile_b):
    (w1, b1, w2, b2, wh, bh, segp, smax_mask, sig_mask) = packed
    b_pad, f_pad = x_pad.shape
    out_pad = wh.shape[1]

    def full(arr):
        return pl.BlockSpec(arr.shape, lambda i: (0, 0))

    return pl.pallas_call(
        _risknet_fused_kernel,
        out_shape=jax.ShapeDtypeStruct((b_pad, out_pad), jnp.float32),
        grid=(b_pad // tile_b,),
        in_specs=[
            pl.BlockSpec((tile_b, f_pad), lambda i: (i, 0)),
            full(w1), full(b1), full(w2), full(b2), full(wh), full(bh),
            full(segp), full(smax_mask), full(sig_mask),
        ],
        out_specs=pl.BlockSpec((tile_b, out_pad), lambda i: (i, 0)),
        compiler_params=pltpu.CompilerParams(
            dimension_semantics=("parallel",)),
    )(x_pad, w1, b1, w2, b2, wh, bh, segp, smax_mask, sig_mask)


# ----------------------------------------------------------------------------
# Parameter construction (PyTorch-style uniform(-1/sqrt(fan_in))) + one-time
# padding/packing into hardware-aligned tiles.
# ----------------------------------------------------------------------------
def _linear_params(key, fan_in, fan_out):
    kw, kb = jax.random.split(key)
    bound = 1.0 / math.sqrt(fan_in)
    w = jax.random.uniform(kw, (fan_in, fan_out), jnp.float32, -bound, bound)
    b = jax.random.uniform(kb, (1, fan_out), jnp.float32, -bound, bound)
    return w, b


def init_risknet(key, hidden_layer=256, territories=42, players=6):
    card_designs = len(Design)
    n_actions = len(Action)
    in_features = (territories * (players + MAXIMUM_POTENTIAL_CARDS + 3)
                   + MAXIMUM_POTENTIAL_CARDS * (card_designs + 1)
                   + n_actions + 2)

    heads = _head_defs(territories)
    keys = jax.random.split(key, 2 + len(heads))

    raw = {}
    raw["w1"], raw["b1"] = _linear_params(keys[0], in_features, hidden_layer)
    raw["w2"], raw["b2"] = _linear_params(keys[1], hidden_layer, hidden_layer)
    for i, (name, out_dim, _) in enumerate(heads):
        raw[name] = _linear_params(keys[2 + i], hidden_layer, out_dim)

    # Packed lane layout for the fused head matrix.
    layout = {}
    start = 0
    for name, out_dim, act in heads:
        layout[name] = (start, out_dim, act)
        start += out_dim
    total_out = start

    f_pad = _pad_to(in_features, 128)
    h_pad = _pad_to(hidden_layer, 128)
    out_pad = _pad_to(total_out, 128)

    # Static segment / activation masks (built once, numpy).
    segp = np.zeros((out_pad, out_pad), np.float32)     # block-diag seg-sum broadcast
    smax_mask = np.zeros((1, out_pad), np.float32)
    sig_mask = np.zeros((1, out_pad), np.float32)
    for name, out_dim, act in heads:
        st, sz, _ = layout[name]
        if act == "softmax":
            segp[st:st + sz, st:st + sz] = 1.0
            smax_mask[0, st:st + sz] = 1.0
        else:
            sig_mask[0, st:st + sz] = 1.0

    # Pad / pack weights once (zeros in the padding, so matmuls are unaffected).
    w1 = jnp.zeros((f_pad, h_pad), jnp.float32).at[:in_features, :hidden_layer].set(raw["w1"])
    b1 = jnp.zeros((1, h_pad), jnp.float32).at[:, :hidden_layer].set(raw["b1"])
    w2 = jnp.zeros((h_pad, h_pad), jnp.float32).at[:hidden_layer, :hidden_layer].set(raw["w2"])
    b2 = jnp.zeros((1, h_pad), jnp.float32).at[:, :hidden_layer].set(raw["b2"])
    wh = jnp.zeros((h_pad, out_pad), jnp.float32)
    bh = jnp.zeros((1, out_pad), jnp.float32)
    for name, out_dim, act in heads:
        st, sz, _ = layout[name]
        w, b = raw[name]
        wh = wh.at[:hidden_layer, st:st + sz].set(w)
        bh = bh.at[:, st:st + sz].set(b)

    packed = (w1, b1, w2, b2, wh, bh,
              jnp.asarray(segp), jnp.asarray(smax_mask), jnp.asarray(sig_mask))
    dims = {"in_features": in_features, "f_pad": f_pad, "h_pad": h_pad,
            "out_pad": out_pad, "total_out": total_out}
    return {"packed": packed, "layout": layout, "dims": dims, "raw": raw}


# ----------------------------------------------------------------------------
# Forward pass mirroring RiskNet.forward's match statement.
# x may be a single state (F,) or a batch (B, F).
# ----------------------------------------------------------------------------
def risknet_forward(model, x, action_taken, selectable_options=None):
    head_names = _ACTION_TO_HEADS.get(action_taken)
    if head_names is None:
        raise RuntimeError(f"Invalid action supplied. Action given: {action_taken}")

    packed, layout, dims = model["packed"], model["layout"], model["dims"]

    x = jnp.asarray(x, jnp.float32)
    single = (x.ndim == 1)
    x2 = x[None, :] if single else x
    B, F = x2.shape
    assert F == dims["in_features"]

    tile_b = min(128, _pad_to(max(B, 1), 8))
    b_pad = _pad_to(B, tile_b)
    x_pad = jnp.zeros((b_pad, dims["f_pad"]), jnp.float32).at[:B, :F].set(x2)

    slab = _slab_forward(packed, x_pad, tile_b=tile_b)   # (b_pad, OUT_PAD)

    mask = None
    if selectable_options:
        mask = jnp.asarray(selectable_options, jnp.float32)

    outs = []
    for name in head_names:
        st, sz, act = layout[name]
        o = slab[:B, st:st + sz]
        # Matches the PyTorch reference: mask applied AFTER softmax.
        if act == "softmax" and mask is not None:
            o = o * mask.reshape(1, sz)
        if single:
            o = o[0]
        outs.append(o)
    return outs[0] if len(outs) == 1 else tuple(outs)


# ----------------------------------------------------------------------------
# Main
# ----------------------------------------------------------------------------
if __name__ == "__main__":
    # Small shapes consistent with the module's __init__ formula.
    hidden_layer = 32
    territories = 8
    players = 3

    root = jax.random.PRNGKey(0)
    k_params, k_x, k_xb = jax.random.split(root, 3)
    model = init_risknet(k_params, hidden_layer=hidden_layer,
                         territories=territories, players=players)
    in_features = model["dims"]["in_features"]   # 8*15 + 9*4 + 11 + 2 = 169

    x = jax.random.normal(k_x, (in_features,), jnp.float32)

    # 1) Attack-target head: masked softmax over (territories + 1) options.
    attack_mask = [1.0, 0.0, 1.0, 1.0, 0.0, 1.0, 1.0, 1.0, 1.0]
    out_attack = risknet_forward(model, x, Action.CHOOSE_ATTACK_TARGET,
                                 selectable_options=attack_mask)

    # 2) PLACE: (masked softmax over territories, sigmoid army fraction) —
    #    both heads come from ONE fused kernel call.
    place_mask = [1.0] * territories
    out_place_terr, out_place_armies = risknet_forward(
        model, x, Action.PLACE, selectable_options=place_mask)

    # 3) CAPTURE: sigmoid scalar head, no mask.
    out_capture = risknet_forward(model, x, Action.CAPTURE)

    # 4) Batched states (grid over batch; weights stay VMEM-resident).
    xb = jax.random.normal(k_xb, (16, in_features), jnp.float32)
    out_claim_batch = risknet_forward(model, xb, Action.CLAIM)

    jax.block_until_ready((out_attack, out_place_terr, out_place_armies,
                           out_capture, out_claim_batch))

    assert out_attack.shape == (territories + 1,)
    assert out_place_terr.shape == (territories,)
    assert out_place_armies.shape == (1,)
    assert out_capture.shape == (1,)
    assert out_claim_batch.shape == (16, territories)

    # Correctness check against a plain-JAX (non-Pallas) reference.
    raw = model["raw"]

    def ref_heads(xin):
        h1 = jnp.tanh(xin @ raw["w1"] + raw["b1"])
        h2 = jnp.tanh(h1 @ raw["w2"] + raw["b2"])
        return h2

    h2_s = ref_heads(x[None, :])
    ref_attack = (jnp.asarray(attack_mask) *
                  jax.nn.softmax(h2_s @ raw["attack_head_target"][0]
                                 + raw["attack_head_target"][1], axis=-1))[0]
    ref_place_t = (jnp.asarray(place_mask) *
                   jax.nn.softmax(h2_s @ raw["placement_head_territory"][0]
                                  + raw["placement_head_territory"][1], axis=-1))[0]
    ref_place_a = jax.nn.sigmoid(h2_s @ raw["placement_head_armies"][0]
                                 + raw["placement_head_armies"][1])[0]
    ref_capture = jax.nn.sigmoid(h2_s @ raw["capture_head"][0]
                                 + raw["capture_head"][1])[0]
    h2_b = ref_heads(xb)
    ref_claim_b = jax.nn.softmax(h2_b @ raw["claim_head"][0]
                                 + raw["claim_head"][1], axis=-1)

    tol = dict(atol=2e-3, rtol=2e-3)
    assert bool(jnp.allclose(out_attack, ref_attack, **tol))
    assert bool(jnp.allclose(out_place_terr, ref_place_t, **tol))
    assert bool(jnp.allclose(out_place_armies, ref_place_a, **tol))
    assert bool(jnp.allclose(out_capture, ref_capture, **tol))
    assert bool(jnp.allclose(out_claim_batch, ref_claim_b, **tol))

    print("KERNEL_OK")
</pallas_src>

<mosaic_0001>
module attributes {stable_mosaic.version = 11 : i64} {
  func.func @_risknet_fused_kernel(%arg0: i32, %arg1: memref<8x256xf32, #tpu.memory_space<vmem>>, %arg2: memref<256x128xf32, #tpu.memory_space<vmem>>, %arg3: memref<1x128xf32, #tpu.memory_space<vmem>>, %arg4: memref<128x128xf32, #tpu.memory_space<vmem>>, %arg5: memref<1x128xf32, #tpu.memory_space<vmem>>, %arg6: memref<128x128xf32, #tpu.memory_space<vmem>>, %arg7: memref<1x128xf32, #tpu.memory_space<vmem>>, %arg8: memref<128x128xf32, #tpu.memory_space<vmem>>, %arg9: memref<1x128xf32, #tpu.memory_space<vmem>>, %arg10: memref<1x128xf32, #tpu.memory_space<vmem>>, %arg11: memref<8x128xf32, #tpu.memory_space<vmem>>) attributes {dimension_semantics = [#tpu.dimension_semantics<parallel>], iteration_bounds = array<i64: 1>, scalar_prefetch = 0 : i64, scratch_operands = 0 : i64, tpu.core_type = #tpu.core_type<tc>, window_params = [{transform_indices = @transform_0, window_bounds = array<i64: 8, 256>}, {pipeline_mode = #tpu.pipeline_mode<synchronous>, transform_indices = @transform_1, window_bounds = array<i64: 256, 128>}, {pipeline_mode = #tpu.pipeline_mode<synchronous>, transform_indices = @transform_2, window_bounds = array<i64: 1, 128>}, {pipeline_mode = #tpu.pipeline_mode<synchronous>, transform_indices = @transform_3, window_bounds = array<i64: 128, 128>}, {pipeline_mode = #tpu.pipeline_mode<synchronous>, transform_indices = @transform_4, window_bounds = array<i64: 1, 128>}, {pipeline_mode = #tpu.pipeline_mode<synchronous>, transform_indices = @transform_5, window_bounds = array<i64: 128, 128>}, {pipeline_mode = #tpu.pipeline_mode<synchronous>, transform_indices = @transform_6, window_bounds = array<i64: 1, 128>}, {pipeline_mode = #tpu.pipeline_mode<synchronous>, transform_indices = @transform_7, window_bounds = array<i64: 128, 128>}, {pipeline_mode = #tpu.pipeline_mode<synchronous>, transform_indices = @transform_8, window_bounds = array<i64: 1, 128>}, {pipeline_mode = #tpu.pipeline_mode<synchronous>, transform_indices = @transform_9, window_bounds = array<i64: 1, 128>}, {transform_indices = @transform_10, window_bounds = array<i64: 8, 128>}]} {
    %c0 = arith.constant 0 : index
    %c0_0 = arith.constant 0 : index
    %0 = vector.load %arg1[%c0, %c0_0] : memref<8x256xf32, #tpu.memory_space<vmem>>, vector<8x256xf32>
    %c0_1 = arith.constant 0 : index
    %c0_2 = arith.constant 0 : index
    %1 = vector.load %arg2[%c0_1, %c0_2] : memref<256x128xf32, #tpu.memory_space<vmem>>, vector<256x128xf32>
    %cst = arith.constant dense<0.000000e+00> : vector<8x128xf32>
    %2 = tpu.matmul %0, %1, %cst {dimension_numbers = #tpu.dot_dimension_numbers<[1], [0], [0], [1], [0, 0, 1, 1], [], []>} : vector<8x256xf32>, vector<256x128xf32>, vector<8x128xf32> -> vector<8x128xf32>
    %c0_3 = arith.constant 0 : index
    %c0_4 = arith.constant 0 : index
    %3 = vector.load %arg3[%c0_3, %c0_4] : memref<1x128xf32, #tpu.memory_space<vmem>>, vector<1x128xf32>
    %4 = vector.broadcast %3 : vector<1x128xf32> to vector<8x128xf32>
    %5 = arith.addf %2, %4 : vector<8x128xf32>
    %6 = math.tanh %5 : vector<8x128xf32>
    %c0_5 = arith.constant 0 : index
    %c0_6 = arith.constant 0 : index
    %7 = vector.load %arg4[%c0_5, %c0_6] : memref<128x128xf32, #tpu.memory_space<vmem>>, vector<128x128xf32>
    %cst_7 = arith.constant dense<0.000000e+00> : vector<8x128xf32>
    %8 = tpu.matmul %6, %7, %cst_7 {dimension_numbers = #tpu.dot_dimension_numbers<[1], [0], [0], [1], [0, 0, 1, 1], [], []>} : vector<8x128xf32>, vector<128x128xf32>, vector<8x128xf32> -> vector<8x128xf32>
    %c0_8 = arith.constant 0 : index
    %c0_9 = arith.constant 0 : index
    %9 = vector.load %arg5[%c0_8, %c0_9] : memref<1x128xf32, #tpu.memory_space<vmem>>, vector<1x128xf32>
    %10 = vector.broadcast %9 : vector<1x128xf32> to vector<8x128xf32>
    %11 = arith.addf %8, %10 : vector<8x128xf32>
    %12 = math.tanh %11 : vector<8x128xf32>
    %c0_10 = arith.constant 0 : index
    %c0_11 = arith.constant 0 : index
    %13 = vector.load %arg6[%c0_10, %c0_11] : memref<128x128xf32, #tpu.memory_space<vmem>>, vector<128x128xf32>
    %cst_12 = arith.constant dense<0.000000e+00> : vector<8x128xf32>
    %14 = tpu.matmul %12, %13, %cst_12 {dimension_numbers = #tpu.dot_dimension_numbers<[1], [0], [0], [1], [0, 0, 1, 1], [], []>} : vector<8x128xf32>, vector<128x128xf32>, vector<8x128xf32> -> vector<8x128xf32>
    %c0_13 = arith.constant 0 : index
    %c0_14 = arith.constant 0 : index
    %15 = vector.load %arg7[%c0_13, %c0_14] : memref<1x128xf32, #tpu.memory_space<vmem>>, vector<1x128xf32>
    %16 = vector.broadcast %15 : vector<1x128xf32> to vector<8x128xf32>
    %17 = arith.addf %14, %16 : vector<8x128xf32>
    %c0_15 = arith.constant 0 : index
    %c0_16 = arith.constant 0 : index
    %18 = vector.load %arg9[%c0_15, %c0_16] : memref<1x128xf32, #tpu.memory_space<vmem>>, vector<1x128xf32>
    %c0_17 = arith.constant 0 : index
    %c0_18 = arith.constant 0 : index
    %19 = vector.load %arg10[%c0_17, %c0_18] : memref<1x128xf32, #tpu.memory_space<vmem>>, vector<1x128xf32>
    %cst_19 = arith.constant 0.000000e+00 : f32
    %20 = vector.broadcast %cst_19 : f32 to vector<1x128xf32>
    %21 = arith.cmpf ogt, %18, %20 : vector<1x128xf32>
    %cst_20 = arith.constant -1.000000e+30 : f32
    %22 = vector.shape_cast %21 : vector<1x128xi1> to vector<1x128xi1>
    %23 = vector.broadcast %22 : vector<1x128xi1> to vector<8x128xi1>
    %24 = vector.broadcast %cst_20 : f32 to vector<8x128xf32>
    %25 = arith.select %23, %17, %24 : vector<8x128xi1>, vector<8x128xf32>
    %cst_21 = arith.constant dense<0xFF800000> : vector<8xf32>
    %26 = vector.multi_reduction <maximumf>, %25, %cst_21 [1] : vector<8x128xf32> to vector<8xf32>
    %27 = vector.shape_cast %26 : vector<8xf32> to vector<8x1xf32>
    %cst_22 = arith.constant 0.000000e+00 : f32
    %28 = vector.broadcast %cst_22 : f32 to vector<1x128xf32>
    %29 = arith.cmpf ogt, %18, %28 : vector<1x128xf32>
    %30 = vector.broadcast %27 : vector<8x1xf32> to vector<8x128xf32>
    %31 = arith.subf %17, %30 : vector<8x128xf32>
    %cst_23 = arith.constant -1.000000e+30 : f32
    %32 = vector.shape_cast %29 : vector<1x128xi1> to vector<1x128xi1>
    %33 = vector.broadcast %32 : vector<1x128xi1> to vector<8x128xi1>
    %34 = vector.broadcast %cst_23 : f32 to vector<8x128xf32>
    %35 = arith.select %33, %31, %34 : vector<8x128xi1>, vector<8x128xf32>
    %36 = math.exp %35 : vector<8x128xf32>
    %c0_24 = arith.constant 0 : index
    %c0_25 = arith.constant 0 : index
    %37 = vector.load %arg8[%c0_24, %c0_25] : memref<128x128xf32, #tpu.memory_space<vmem>>, vector<128x128xf32>
    %cst_26 = arith.constant dense<0.000000e+00> : vector<8x128xf32>
    %38 = tpu.matmul %36, %37, %cst_26 {dimension_numbers = #tpu.dot_dimension_numbers<[1], [0], [0], [1], [0, 0, 1, 1], [], []>} : vector<8x128xf32>, vector<128x128xf32>, vector<8x128xf32> -> vector<8x128xf32>
    %cst_27 = arith.constant 0.000000e+00 : f32
    %39 = vector.broadcast %cst_27 : f32 to vector<8x128xf32>
    %40 = arith.cmpf ogt, %38, %39 : vector<8x128xf32>
    %cst_28 = arith.constant 1.000000e+00 : f32
    %41 = vector.broadcast %cst_28 : f32 to vector<8x128xf32>
    %42 = arith.select %40, %38, %41 : vector<8x128xi1>, vector<8x128xf32>
    %43 = tpu.reciprocal %42 {approx = true} : vector<8x128xf32> -> vector<8x128xf32>
    %44 = arith.mulf %36, %43 : vector<8x128xf32>
    %cst_29 = arith.constant 5.000000e-01 : f32
    %45 = vector.broadcast %cst_29 : f32 to vector<8x128xf32>
    %46 = arith.mulf %45, %17 : vector<8x128xf32>
    %47 = math.tanh %46 : vector<8x128xf32>
    %cst_30 = arith.constant 1.000000e+00 : f32
    %48 = vector.broadcast %cst_30 : f32 to vector<8x128xf32>
    %49 = arith.addf %47, %48 : vector<8x128xf32>
    %cst_31 = arith.constant 5.000000e-01 : f32
    %50 = vector.broadcast %cst_31 : f32 to vector<8x128xf32>
    %51 = arith.mulf %50, %49 : vector<8x128xf32>
    %52 = vector.broadcast %19 : vector<1x128xf32> to vector<8x128xf32>
    %53 = arith.mulf %52, %51 : vector<8x128xf32>
    %54 = arith.addf %44, %53 : vector<8x128xf32>
    %c0_32 = arith.constant 0 : index
    %c0_33 = arith.constant 0 : index
    %55 = vector.load %arg11[%c0_32, %c0_33] : memref<8x128xf32, #tpu.memory_space<vmem>>, vector<8x128xf32>
    tpu.vector_store %arg11[%c0_32, %c0_33], %54 {strides = array<i32>} : memref<8x128xf32, #tpu.memory_space<vmem>>, vector<8x128xf32>,
    return
  }
  func.func @transform_0(%arg0: i32) -> (i32, i32) {
    %c0_i32 = arith.constant 0 : i32
    %c0_i32_0 = arith.constant 0 : i32
    return %arg0, %c0_i32 : i32, i32
  }
  func.func @transform_1(%arg0: i32) -> (i32, i32) {
    %c0_i32 = arith.constant 0 : i32
    %c0_i32_0 = arith.constant 0 : i32
    %c0_i32_1 = arith.constant 0 : i32
    return %c0_i32, %c0_i32_0 : i32, i32
  }
  func.func @transform_2(%arg0: i32) -> (i32, i32) {
    %c0_i32 = arith.constant 0 : i32
    %c0_i32_0 = arith.constant 0 : i32
    %c0_i32_1 = arith.constant 0 : i32
    return %c0_i32, %c0_i32_0 : i32, i32
  }
  func.func @transform_3(%arg0: i32) -> (i32, i32) {
    %c0_i32 = arith.constant 0 : i32
    %c0_i32_0 = arith.constant 0 : i32
    %c0_i32_1 = arith.constant 0 : i32
    return %c0_i32, %c0_i32_0 : i32, i32
  }
  func.func @transform_4(%arg0: i32) -> (i32, i32) {
    %c0_i32 = arith.constant 0 : i32
    %c0_i32_0 = arith.constant 0 : i32
    %c0_i32_1 = arith.constant 0 : i32
    return %c0_i32, %c0_i32_0 : i32, i32
  }
  func.func @transform_5(%arg0: i32) -> (i32, i32) {
    %c0_i32 = arith.constant 0 : i32
    %c0_i32_0 = arith.constant 0 : i32
    %c0_i32_1 = arith.constant 0 : i32
    return %c0_i32, %c0_i32_0 : i32, i32
  }
  func.func @transform_6(%arg0: i32) -> (i32, i32) {
    %c0_i32 = arith.constant 0 : i32
    %c0_i32_0 = arith.constant 0 : i32
    %c0_i32_1 = arith.constant 0 : i32
    return %c0_i32, %c0_i32_0 : i32, i32
  }
  func.func @transform_7(%arg0: i32) -> (i32, i32) {
    %c0_i32 = arith.constant 0 : i32
    %c0_i32_0 = arith.constant 0 : i32
    %c0_i32_1 = arith.constant 0 : i32
    return %c0_i32, %c0_i32_0 : i32, i32
  }
  func.func @transform_8(%arg0: i32) -> (i32, i32) {
    %c0_i32 = arith.constant 0 : i32
    %c0_i32_0 = arith.constant 0 : i32
    %c0_i32_1 = arith.constant 0 : i32
    return %c0_i32, %c0_i32_0 : i32, i32
  }
  func.func @transform_9(%arg0: i32) -> (i32, i32) {
    %c0_i32 = arith.constant 0 : i32
    %c0_i32_0 = arith.constant 0 : i32
    %c0_i32_1 = arith.constant 0 : i32
    return %c0_i32, %c0_i32_0 : i32, i32
  }
  func.func @transform_10(%arg0: i32) -> (i32, i32) {
    %c0_i32 = arith.constant 0 : i32
    %c0_i32_0 = arith.constant 0 : i32
    return %arg0, %c0_i32 : i32, i32
  }
}

</mosaic_0001>

<bundles_post_ra>
// kernel: _slab_forward.1
= control target key start
LH: loop header
LB: loop body
LE: loop exit
PB: predicated region body
PF: predicated region fallthrough
CT: control target
= control target key end

     0   :  { %15 = vsyncpa [#allocation3], 0  ;;  %s1166_s0 = inlined_call_operand.vmem [shape: f32[8,256], index: 0, kind: input, shape index: {}]   ;;  %s1167_s1 = inlined_call_operand.hbm [shape: f32[256,128], index: 1, kind: input, shape index: {}]   ;;  %s1168_s2 = inlined_call_operand.vmem [shape: f32[1,128], index: 2, kind: input, shape index: {}]   ;;  %s1169_s3 = inlined_call_operand.hbm [shape: f32[128,128], index: 3, kind: input, shape index: {}]   ;;  %s1170_s4 = inlined_call_operand.vmem [shape: f32[1,128], index: 4, kind: input, shape index: {}]   ;;  %s1171_s5 = inlined_call_operand.hbm [shape: f32[128,128], index: 5, kind: input, shape index: {}]   ;;  %s1172_s6 = inlined_call_operand.vmem [shape: f32[1,128], index: 6, kind: input, shape index: {}]   ;;  %s1173_s7 = inlined_call_operand.hbm [shape: f32[128,128], index: 7, kind: input, shape index: {}]   ;;  %s1174_s8 = inlined_call_operand.vmem [shape: f32[1,128], index: 8, kind: input, shape index: {}]   ;;  %s1175_s9 = inlined_call_operand.vmem [shape: f32[1,128], index: 9, kind: input, shape index: {}]   ;;  %s1176_s10 = inlined_call_operand.hbm [shape: f32[8,128], index: 10, kind: output, shape index: {}]  }
   0x1   :  { %16 = vsyncpa [#allocation6], 0 }
   0x2   :  { %17 = vsyncpa [#allocation9], 0 }
   0x3   :  { %18 = vsyncpa [#allocation4], 0  ;;  %s964_s13 = smov [#allocation5]   ;;  %s965_s15 = smov [#allocation2]  }
   0x4   :  { %s40_s14 = sshll.u32 %s964_s13, 4  ;;  %s26_s16 = sshll.u32 %s965_s15, 4  ;;  %s41_s14 = int_to_ptr.vmem [resolvable:$true] %s40_s14  ;;  %s1030_s16 = int_to_ptr.vmem [resolvable:$true] %s26_s16 }
   0x5   :  { %s846_s19 = scalar_lea.hbm %s1169_s3, 2048 }
   0x6   :  { %p847_p0 = scmp.ne.s32.totalorder %s1169_s3, %s846_s19  ;;  %p850_p1 = scmp.lt.u32.totalorder %s846_s19, %s1169_s3 }
   0x8   :  { %p852_p2 = pnand %p850_p1, %p847_p0 }
   0xa   :  { %855 = shalt.err (!%p852_p2)
}
   0xb   :  { %s856_s24 = scalar_lea.vmem %s41_s14, 2048  ;;  %p861_p4 = scmp.lt.s32.totalorder %s41_s14, %s41_s14 }
   0xc   :  { %p857_p3 = scmp.ne.s32.totalorder %s41_s14, %s856_s24  ;;  %p862_p5 = scmp.lt.s32.totalorder %s856_s24, %s856_s24 }
   0xe   :  { %p863_p6 = por %p862_p5, %p861_p4 }
  0x10   :  { %p864_p7 = pnand %p863_p6, %p857_p3 }
  0x12   :  { %867 = shalt.err (!%p864_p7)
}
  0x13   :  { %s966_s25 = smov 128   ;;  %s967_s26 = smov 8  }
  0x14   :  { %46 = dma.hbm_to_vmem [thread:$0]  %s1169_s3, 2048, %s41_s14, [#allocation6], %s966_s25, %s966_s25, %s967_s26  }
  0x15   :  { %s868_s11 = scalar_lea.hbm %s1167_s1, 4096 }
  0x16   :  { %p869_p8 = scmp.ne.s32.totalorder %s1167_s1, %s868_s11  ;;  %p872_p9 = scmp.lt.u32.totalorder %s868_s11, %s1167_s1 }
  0x18   :  { %p874_p10 = pnand %p872_p9, %p869_p8 }
  0x1a   :  { %877 = shalt.err (!%p874_p10)
}
  0x1b   :  { %s878_s18 = scalar_lea.vmem %s1030_s16, 4096  ;;  %p883_p12 = scmp.lt.s32.totalorder %s1030_s16, %s1030_s16 }
  0x1c   :  { %p879_p11 = scmp.ne.s32.totalorder %s1030_s16, %s878_s18  ;;  %p884_p13 = scmp.lt.s32.totalorder %s878_s18, %s878_s18 }
  0x1e   :  { %p885_p0 = por %p884_p13, %p883_p12 }
  0x20   :  { %p886_p1 = pnand %p885_p0, %p879_p11 }
  0x22   :  { %889 = shalt.err (!%p886_p1)
}
  0x23   :  { %32 = dma.hbm_to_vmem [thread:$0]  %s1167_s1, 4096, %s1030_s16, [#allocation3], %s966_s25, %s966_s25, %s967_s26  }
  0x24   :  { %s968_s19 = smov [#allocation7]   ;;  %s969_s21 = smov [#allocation8]  }
  0x25   :  { %s54_s20 = sshll.u32 %s968_s19, 4  ;;  %s68_s22 = sshll.u32 %s969_s21, 4  ;;  %s55_s20 = int_to_ptr.vmem [resolvable:$true] %s54_s20  ;;  %s1067_s22 = int_to_ptr.vmem [resolvable:$true] %s68_s22 }
  0x26   :  { %s890_s27 = scalar_lea.hbm %s1171_s5, 2048 }
  0x27   :  { %p891_p2 = scmp.ne.s32.totalorder %s1171_s5, %s890_s27  ;;  %p894_p3 = scmp.lt.u32.totalorder %s890_s27, %s1171_s5 }
  0x29   :  { %p896_p4 = pnand %p894_p3, %p891_p2 }
  0x2b   :  { %899 = shalt.err (!%p896_p4)
}
  0x2c   :  { %s900_s1 = scalar_lea.vmem %s55_s20, 2048  ;;  %p905_p6 = scmp.lt.s32.totalorder %s55_s20, %s55_s20 }
  0x2d   :  { %p901_p5 = scmp.ne.s32.totalorder %s55_s20, %s900_s1  ;;  %p906_p7 = scmp.lt.s32.totalorder %s900_s1, %s900_s1 }
  0x2f   :  { %p907_p8 = por %p906_p7, %p905_p6 }
  0x31   :  { %p908_p9 = pnand %p907_p8, %p901_p5 }
  0x33   :  { %911 = shalt.err (!%p908_p9)
}
  0x34   :  { %60 = dma.hbm_to_vmem [thread:$0]  %s1171_s5, 2048, %s55_s20, [#allocation6], %s966_s25, %s966_s25, %s967_s26  }
  0x35   :  { %s912_s17 = scalar_lea.hbm %s1173_s7, 2048 }
  0x36   :  { %p913_p10 = scmp.ne.s32.totalorder %s1173_s7, %s912_s17  ;;  %p916_p11 = scmp.lt.u32.totalorder %s912_s17, %s1173_s7 }
  0x38   :  { %p918_p12 = pnand %p916_p11, %p913_p10 }
  0x3a   :  { %921 = shalt.err (!%p918_p12)
}
  0x3b   :  { %s922_s21 = scalar_lea.vmem %s1067_s22, 2048  ;;  %p927_p0 = scmp.lt.s32.totalorder %s1067_s22, %s1067_s22 }
  0x3c   :  { %p923_p13 = scmp.ne.s32.totalorder %s1067_s22, %s922_s21  ;;  %p928_p1 = scmp.lt.s32.totalorder %s922_s21, %s922_s21 }
  0x3e   :  { %p929_p2 = por %p928_p1, %p927_p0 }
  0x40   :  { %p930_p3 = pnand %p929_p2, %p923_p13 }
  0x42   :  { %933 = shalt.err (!%p930_p3)
}
  0x43   :  { %74 = dma.hbm_to_vmem [thread:$0]  %s1173_s7, 2048, %s1067_s22, [#allocation9], %s966_s25, %s966_s25, %s967_s26  }
  0x44   :  { %956 = dma.done.wait [#allocation3], 4096  }
  0x45   :  { %957 = vsyncadd [#allocation3], 4294963200 }
  0x46   :  { %958 = dma.done.wait [#allocation6], 4096  }
  0x47   :  { %959 = vsyncadd [#allocation6], 4294963200 }
  0x48   :  { %960 = dma.done.wait [#allocation9], 2048  }
  0x49   :  { %961 = vsyncadd [#allocation9], 4294965248  ;;  %v970_v0 = vmov 0.0|0.0   ;;  %v109_v1 = vld [vmem:[#allocation2 + $0x80] sm:$0xff]  ;;  %v110_v2 = vld [vmem:[#allocation2 + $0x88] sm:$0xff]  ;;  %vm971_vm0 = vmmov 0  }
  0x4a   :  { %753 = vmatprep.subr.bf16.mxu1 %v970_v0  ;;  %v93_v3 = vld [vmem:[#allocation2] sm:$0xff]  ;;  %v721_v4 = vpack.c.bf16 %v110_v2, %v109_v1  ;;  %v94_v5 = vld [vmem:[#allocation2 + $0x8] sm:$0xff]  ;;  %v111_v6 = vld [vmem:[#allocation2 + $0x90] sm:$0xff]  ;;  %s974_s30 = smov [#allocation10]  }
  0x4b   :  { %v112_v7 = vld [vmem:[#allocation2 + $0x98] sm:$0xff]  ;;  %v723_v8 = vpack.c.bf16 %v94_v5, %v93_v3  ;;  %v95_v10 = vld [vmem:[#allocation2 + $0x10] sm:$0xff]  ;;  %v113_v12 = vld [vmem:[#allocation2 + $0xa0] sm:$0xff]  ;;  %s515_s11 = sshll.u32 %s974_s30, 4  ;;  %s516_s11 = int_to_ptr.vmem [resolvable:$true] %s515_s11 }
  0x4c   :  { %v725_v9 = vpack.c.bf16 %v112_v7, %v111_v6  ;;  %v96_v11 = vld [vmem:[#allocation2 + $0x18] sm:$0xff]  ;;  %722 = vmatprep.subr.bf16.mxu0 %v721_v4  ;;  %v114_v13 = vld [vmem:[#allocation2 + $0xa8] sm:$0xff]  ;;  %v97_v16 = vld [vmem:[#allocation2 + $0x20] sm:$0xff]  ;;  %s934_s1 = scalar_lea.vmem %s516_s11, 128  ;;  %p939_p5 = scmp.lt.s32.totalorder %s516_s11, %s516_s11 }
  0x4d   :  { %724 = vmatpush3.bf16.msra.mxu0 %v723_v8  ;;  %v727_v14 = vpack.c.bf16 %v96_v11, %v95_v10  ;;  %v729_v15 = vpack.c.bf16 %v114_v13, %v113_v12  ;;  %v98_v17 = vld [vmem:[#allocation2 + $0x28] sm:$0xff]  ;;  %v115_v18 = vld [vmem:[#allocation2 + $0xb0] sm:$0xff]  ;;  %v116_v19 = vld [vmem:[#allocation2 + $0xb8] sm:$0xff]  ;;  %v972_v11 = vmov 0.0   ;;  %p935_p4 = scmp.ne.s32.totalorder %s516_s11, %s934_s1  ;;  %p940_p6 = scmp.lt.s32.totalorder %s934_s1, %s934_s1 }
  0x4e   :  { %726 = vmatprep.subr.bf16.mxu0 %v725_v9  ;;  %v731_v20 = vpack.c.bf16 %v98_v17, %v97_v16  ;;  %v733_v21 = vpack.c.bf16 %v116_v19, %v115_v18  ;;  %v99_v22 = vld [vmem:[#allocation2 + $0x30] sm:$0xff]  ;;  %v100_v23 = vld [vmem:[#allocation2 + $0x38] sm:$0xff]  ;;  %v117_v24 = vld [vmem:[#allocation2 + $0xc0] sm:$0xff]  ;;  %648 = vmatprep.mubr.msk.f32.mxu1 %vm971_vm0, %v972_v11 }
  0x4f   :  { %v118_v25 = vld [vmem:[#allocation2 + $0xc8] sm:$0xff]  ;;  %v203_v27 = vld [vmem:[#allocation5] sm:$0xff]  ;;  %v735_v29 = vpack.c.bf16 %v100_v23, %v99_v22  ;;  %v205_v31 = vld [vmem:[#allocation5 + $0x10] sm:$0xff]  ;;  %p941_p7 = por %p940_p6, %p939_p5 }
  0x50   :  { %v92_v26 = vld [vmem:[%s1166_s0 + $0x8] sm:$0xff]  ;;  %v206_v32 = vld [vmem:[#allocation5 + $0x18] sm:$0xff]  ;;  %v737_v33 = vpack.c.bf16 %v118_v25, %v117_v24  ;;  %v101_v34 = vld [vmem:[#allocation2 + $0x40] sm:$0xff] }
  0x51   :  { %728 = vmatpush3.bf16.msra.mxu0 %v727_v14  ;;  %196 = vmatprep.mubr.f32.mxu0 %v92_v26  ;;  %v204_v28 = vld [vmem:[#allocation5 + $0x8] sm:$0xff]  ;;  %v119_v36 = vld [vmem:[#allocation2 + $0xd0] sm:$0xff]  ;;  %v120_v37 = vld [vmem:[#allocation2 + $0xd8] sm:$0xff]  ;;  %v757_v38 = vpack.c.bf16 %v206_v32, %v205_v31  ;;  %p942_p8 = pnand %p941_p7, %p935_p4 }
  0x52   :  { %730 = vmatprep.subr.bf16.mxu0 %v729_v15  ;;  %v754_v30 = vpack.c.bf16 %v204_v28, %v203_v27  ;;  %v102_v35 = vld [vmem:[#allocation2 + $0x48] sm:$0xff]  ;;  %v207_v39 = vld [vmem:[#allocation5 + $0x20] sm:$0xff]  ;;  %v741_v42 = vpack.c.bf16 %v120_v37, %v119_v36  ;;  %v103_v43 = vld [vmem:[#allocation2 + $0x50] sm:$0xff] }
  0x53   :  { %v208_v40 = vld [vmem:[#allocation5 + $0x28] sm:$0xff]  ;;  %v739_v41 = vpack.c.bf16 %v102_v35, %v101_v34  ;;  %v104_v44 = vld [vmem:[#allocation2 + $0x58] sm:$0xff]  ;;  %v121_v45 = vld [vmem:[#allocation2 + $0xe0] sm:$0xff] }
  0x54   :  { %755 = vmatpush3.bf16.msra.mxu1 %v754_v30  ;;  %v122_v46 = vld [vmem:[#allocation2 + $0xe8] sm:$0xff]  ;;  %v760_v47 = vpack.c.bf16 %v208_v40, %v207_v39  ;;  %v209_v48 = vld [vmem:[#allocation5 + $0x30] sm:$0xff]  ;;  %v210_v49 = vld [vmem:[#allocation5 + $0x38] sm:$0xff]  ;;  %v743_v50 = vpack.c.bf16 %v104_v44, %v103_v43 }
  0x55   :  { %732 = vmatpush3.bf16.msra.mxu0 %v731_v20  ;;  %756 = vmatprep.subr.bf16.mxu1 %v970_v0  ;;  %v745_v51 = vpack.c.bf16 %v122_v46, %v121_v45  ;;  %v105_v52 = vld [vmem:[#allocation2 + $0x60] sm:$0xff]  ;;  %v106_v53 = vld [vmem:[#allocation2 + $0x68] sm:$0xff]  ;;  %v123_v54 = vld [vmem:[#allocation2 + $0xf0] sm:$0xff]  ;;  %v763_v56 = vpack.c.bf16 %v210_v49, %v209_v48 }
  0x56   :  { %734 = vmatprep.subr.bf16.mxu0 %v733_v21  ;;  %v124_v55 = vld [vmem:[#allocation2 + $0xf8] sm:$0xff]  ;;  %v747_v57 = vpack.c.bf16 %v106_v53, %v105_v52  ;;  %v107_v59 = vld [vmem:[#allocation2 + $0x70] sm:$0xff]  ;;  %v91_v62 = vld [vmem:[%s1166_s0] sm:$0xff] }
  0x57   :  { %v749_v58 = vpack.c.bf16 %v124_v55, %v123_v54  ;;  %v108_v60 = vld [vmem:[#allocation2 + $0x78] sm:$0xff]  ;;  %v211_v63 = vld [vmem:[#allocation5 + $0x40] sm:$0xff]  ;;  %v212_v1 = vld [vmem:[#allocation5 + $0x48] sm:$0xff] }
  0x58   :  { %758 = vmatpush3.bf16.msra.mxu1 %v757_v38  ;;  %v751_v61 = vpack.c.bf16 %v108_v60, %v107_v59  ;;  %v766_v2 = vpack.c.bf16 %v212_v1, %v211_v63  ;;  %v213_v3 = vld [vmem:[#allocation5 + $0x50] sm:$0xff]  ;;  %v214_v4 = vld [vmem:[#allocation5 + $0x58] sm:$0xff]  ;;  %v215_v6 = vld [vmem:[#allocation5 + $0x60] sm:$0xff]  ;;  %v394_v60 = vlaneseq  ;;  %v973_v1 = vmov 0  }
  0x59   :  { %736 = vmatpush3.bf16.msra.mxu0 %v735_v29  ;;  %759 = vmatprep.subr.bf16.mxu1 %v970_v0  ;;  %v769_v5 = vpack.c.bf16 %v214_v4, %v213_v3  ;;  %v216_v7 = vld [vmem:[#allocation5 + $0x68] sm:$0xff]  ;;  %v217_v9 = vld [vmem:[#allocation5 + $0x70] sm:$0xff]  ;;  %v218_v10 = vld [vmem:[#allocation5 + $0x78] sm:$0xff] }
  0x5a   :  { %738 = vmatprep.subr.bf16.mxu0 %v737_v33  ;;  %v772_v8 = vpack.c.bf16 %v216_v7, %v215_v6  ;;  %v775_v12 = vpack.c.bf16 %v218_v10, %v217_v9  ;;  %v297_v13 = vld [vmem:[#allocation7] sm:$0xff]  ;;  %v298_v14 = vld [vmem:[#allocation7 + $0x8] sm:$0xff]  ;;  %v299_v15 = vld [vmem:[#allocation7 + $0x10] sm:$0xff] }
  0x5b   :  { %v778_v16 = vpack.c.bf16 %v298_v14, %v297_v13  ;;  %v300_v17 = vld [vmem:[#allocation7 + $0x18] sm:$0xff]  ;;  %v301_v19 = vld [vmem:[#allocation7 + $0x20] sm:$0xff]  ;;  %v302_v20 = vld [vmem:[#allocation7 + $0x28] sm:$0xff] }
  0x5c   :  { %761 = vmatpush3.bf16.msra.mxu1 %v760_v47  ;;  %v781_v18 = vpack.c.bf16 %v300_v17, %v299_v15  ;;  %v784_v21 = vpack.c.bf16 %v302_v20, %v301_v19  ;;  %v303_v22 = vld [vmem:[#allocation7 + $0x30] sm:$0xff]  ;;  %v304_v23 = vld [vmem:[#allocation7 + $0x38] sm:$0xff]  ;;  %v305_v25 = vld [vmem:[#allocation7 + $0x40] sm:$0xff] }
  0x5d   :  { %740 = vmatpush3.bf16.msra.mxu0 %v739_v41  ;;  %762 = vmatprep.subr.bf16.mxu1 %v970_v0  ;;  %v787_v24 = vpack.c.bf16 %v304_v23, %v303_v22  ;;  %v306_v26 = vld [vmem:[#allocation7 + $0x48] sm:$0xff]  ;;  %v526_v29 = vld [vmem:[%s1168_s2] ss:$0 sm:$0xff]  ;;  %v307_v34 = vld [vmem:[#allocation7 + $0x50] sm:$0xff] }
  0x5e   :  { %742 = vmatprep.subr.bf16.mxu0 %v741_v42  ;;  %v790_v27 = vpack.c.bf16 %v306_v26, %v305_v25  ;;  %v308_v35 = vld [vmem:[#allocation7 + $0x58] sm:$0xff]  ;;  %v309_v37 = vld [vmem:[#allocation7 + $0x60] sm:$0xff]  ;;  %v310_v38 = vld [vmem:[#allocation7 + $0x68] sm:$0xff] }
  0x5f   :  { %v793_v36 = vpack.c.bf16 %v308_v35, %v307_v34  ;;  %v796_v39 = vpack.c.bf16 %v310_v38, %v309_v37  ;;  %v311_v40 = vld [vmem:[#allocation7 + $0x70] sm:$0xff]  ;;  %v312_v41 = vld [vmem:[#allocation7 + $0x78] sm:$0xff]  ;;  %v527_v43 = vld [vmem:[%s1170_s4] ss:$0 sm:$0xff] }
  0x60   :  { %764 = vmatpush3.bf16.msra.mxu1 %v763_v56  ;;  %v799_v42 = vpack.c.bf16 %v312_v41, %v311_v40  ;;  %v406_v48 = vld [vmem:[#allocation8] sm:$0xff]  ;;  %v407_v49 = vld [vmem:[#allocation8 + $0x8] sm:$0xff]  ;;  %v409_v52 = vld [vmem:[#allocation8 + $0x18] sm:$0xff] }
  0x61   :  { %744 = vmatpush3.bf16.msra.mxu0 %v743_v50  ;;  %765 = vmatprep.subr.bf16.mxu1 %v970_v0  ;;  %v408_v50 = vld [vmem:[#allocation8 + $0x10] sm:$0xff]  ;;  %v410_v54 = vld [vmem:[#allocation8 + $0x20] sm:$0xff]  ;;  %v411_v55 = vld [vmem:[#allocation8 + $0x28] sm:$0xff] }
  0x62   :  { %746 = vmatprep.subr.bf16.mxu0 %v745_v51  ;;  %v802_v51 = vpack.c.bf16 %v407_v49, %v406_v48  ;;  %v805_v53 = vpack.c.bf16 %v409_v52, %v408_v50  ;;  %v808_v56 = vpack.c.bf16 %v411_v55, %v410_v54  ;;  %v528_v4 = vld [vmem:[%s1172_s6] ss:$0 sm:$0xff]  ;;  %v415_v10 = vld [vmem:[#allocation8 + $0x48] sm:$0xff]  ;;  %v417_v13 = vld [vmem:[#allocation8 + $0x58] sm:$0xff] }
  0x63   :  { %v414_v9 = vld [vmem:[#allocation8 + $0x40] sm:$0xff]  ;;  %v421_v19 = vld [vmem:[#allocation8 + $0x78] sm:$0xff] }
  0x64   :  { %767 = vmatpush3.bf16.msra.mxu1 %v766_v2  ;;  %v418_v15 = vld [vmem:[#allocation8 + $0x60] sm:$0xff] }
  0x65   :  { %748 = vmatpush3.bf16.msra.mxu0 %v747_v57  ;;  %768 = vmatprep.subr.bf16.mxu1 %v970_v0  ;;  %v412_v57 = vld [vmem:[#allocation8 + $0x30] sm:$0xff] }
  0x66   :  { %750 = vmatprep.subr.bf16.mxu0 %v749_v58  ;;  %v413_v58 = vld [vmem:[#allocation8 + $0x38] sm:$0xff] }
  0x67   :  { %v811_v59 = vpack.c.bf16 %v413_v58, %v412_v57 }
  0x68   :  { %770 = vmatpush3.bf16.msra.mxu1 %v769_v5 }
  0x69   :  { %752 = vmatpush3.bf16.msra.mxu0 %v751_v61  ;;  %771 = vmatprep.subr.bf16.mxu1 %v970_v0  ;;  %v390_v61 = vld [vmem:[%s1174_s8] sm:$0x1] }
  0x6a   :  { %777 = vmatprep.subr.bf16.mxu0 %v970_v0  ;;  %vm392_vm1 = vcmp.gt.f32.partialorder %v390_v61, 0.0 }
  0x6b   :  { %v393_v2 = vsel %vm392_vm1, 1, %v973_v1 }
  0x6c   :  { %197 = vmatmul.mubr.f32.vlgmr.msra.gmra.mrb[0].mxu0 %v91_v62  ;;  %773 = vmatpush3.bf16.msra.mxu1 %v772_v8  ;;  %v395_v62 = vshrl.u32 %v394_v60, 7 }
  0x6d   :  { %683 = vmatprep.mubr.msk.f32.mxu0 %vm971_vm0, %v972_v11  ;;  %774 = vmatprep.subr.bf16.mxu1 %v970_v0 }
  0x6e   :  { %779 = vmatpush3.bf16.msra.mxu0 %v778_v16  ;;  %v396_v63 = vsub.s32 0, %v395_v62  ;;  %v419_v16 = vld [vmem:[#allocation8 + $0x68] sm:$0xff] }
  0x6f   :  { %780 = vmatprep.subr.bf16.mxu0 %v970_v0  ;;  %v820_v17 = vpack.c.bf16 %v419_v16, %v418_v15 }
  0x70   :  { %776 = vmatpush3.bf16.msra.mxu1 %v775_v12  ;;  %v397_v3 = vrot.slane %v393_v2, %v396_v63  ;;  %v416_v12 = vld [vmem:[#allocation8 + $0x50] sm:$0xff] }
  0x71   :  { %801 = vmatprep.subr.bf16.mxu1 %v970_v0  ;;  %v817_v14 = vpack.c.bf16 %v417_v13, %v416_v12 }
  0x72   :  { %782 = vmatpush3.bf16.msra.mxu0 %v781_v18  ;;  %vm398_vm2 = vcmp.eq.s32.totalorder %v397_v3, 1  ;;  %v420_v18 = vld [vmem:[#allocation8 + $0x70] sm:$0xff] }
  0x73   :  { %783 = vmatprep.subr.bf16.mxu0 %v970_v0  ;;  %v823_v20 = vpack.c.bf16 %v421_v19, %v420_v18 }
  0x76   :  { %785 = vmatpush3.bf16.msra.mxu0 %v784_v21 }
  0x77   :  { %786 = vmatprep.subr.bf16.mxu0 %v970_v0 }
  0x7a   :  { %788 = vmatpush3.bf16.msra.mxu0 %v787_v24 }
  0x7b   :  { %789 = vmatprep.subr.bf16.mxu0 %v970_v0 }
  0x7e   :  { %791 = vmatpush3.bf16.msra.mxu0 %v790_v27 }
  0x7f   :  { %792 = vmatprep.subr.bf16.mxu0 %v970_v0 }
  0x82   :  { %794 = vmatpush3.bf16.msra.mxu0 %v793_v36 }
  0x83   :  { %795 = vmatprep.subr.bf16.mxu0 %v970_v0 }
  0x86   :  { %797 = vmatpush3.bf16.msra.mxu0 %v796_v39 }
  0x87   :  { %798 = vmatprep.subr.bf16.mxu0 %v970_v0 }
  0x8a   :  { %800 = vmatpush3.bf16.msra.mxu0 %v799_v42 }
 0x13f   :  { %v562_v28 = vpop.f32.mrb[0].mxu0 }
 0x140   :  { %v563_v30 = vpop.f32.mrb[1].mxu0 }
 0x141   :  { %v564_v31 = vadd.f32 %v563_v30, %v562_v28 }
 0x143   :  { %v199_v32 = vadd.f32 %v564_v31, %v526_v29 }
 0x145   :  { %836 = vtanh.f32 %v199_v32 }
 0x14f   :  { %v837_v33 = vpop.eup %836 }
 0x150   :  { %649 = vmatmul.mubr.f32.vlgmr.msra.gmra.mrb[0].mxu1 %v837_v33 }
 0x151   :  { %718 = vmatprep.mubr.msk.f32.mxu1 %vm971_vm0, %v972_v11  ;;  %803 = vmatpush3.bf16.msra.mxu1 %v802_v51  ;;  %v814_v11 = vpack.c.bf16 %v415_v10, %v414_v9 }
 0x152   :  { %804 = vmatprep.subr.bf16.mxu1 %v970_v0 }
 0x155   :  { %806 = vmatpush3.bf16.msra.mxu1 %v805_v53 }
 0x156   :  { %807 = vmatprep.subr.bf16.mxu1 %v970_v0 }
 0x159   :  { %809 = vmatpush3.bf16.msra.mxu1 %v808_v56 }
 0x15a   :  { %810 = vmatprep.subr.bf16.mxu1 %v970_v0 }
 0x15d   :  { %812 = vmatpush3.bf16.msra.mxu1 %v811_v59 }
 0x15e   :  { %813 = vmatprep.subr.bf16.mxu1 %v970_v0 }
 0x161   :  { %815 = vmatpush3.bf16.msra.mxu1 %v814_v11 }
 0x162   :  { %816 = vmatprep.subr.bf16.mxu1 %v970_v0 }
 0x165   :  { %818 = vmatpush3.bf16.msra.mxu1 %v817_v14 }
 0x166   :  { %819 = vmatprep.subr.bf16.mxu1 %v970_v0 }
 0x169   :  { %821 = vmatpush3.bf16.msra.mxu1 %v820_v17 }
 0x16a   :  { %822 = vmatprep.subr.bf16.mxu1 %v970_v0  ;;  %v529_v0 = vld [vmem:[%s1175_s9] ss:$0 sm:$0xff] }
 0x16d   :  { %824 = vmatpush3.bf16.msra.mxu1 %v823_v20 }
 0x223   :  { %v292_v44 = vpop.f32.mrb[0].mxu1 }
 0x224   :  { %v293_v45 = vadd.f32 %v527_v43, %v292_v44  ;;  %v650_v46 = vpop.f32.mrb[1].mxu1 }
 0x226   :  { %838 = vtanh.f32 %v293_v45 }
 0x230   :  { %v839_v47 = vpop.eup %838 }
 0x231   :  { %684 = vmatmul.mubr.f32.vlgmr.msra.gmra.mrb[2].mxu0 %v839_v47 }
 0x304   :  { %v386_v5 = vpop.f32.mrb[2].mxu0 }
 0x305   :  { %v387_v6 = vadd.f32 %v528_v4, %v386_v5  ;;  %v685_v7 = vpop.f32.mrb[3].mxu0 }
 0x307   :  { %v399_v8 = vsel %vm398_vm2, %v387_v6, -1e+30  ;;  %v496_v26 = vmul.f32 0.5, %v387_v6 }
 0x308   :  { %400 = vmax.xlane.f32.xlu0 %v399_v8 }
 0x395   :  { %v401_v21 = vpop.xlane.xlu0 %400 }
 0x396   :  { %v402_v22 = vsub.f32 %v387_v6, %v401_v21 }
 0x398   :  { %v403_v23 = vsel %vm398_vm2, %v402_v22, -1e+30 }
 0x399   :  { %v404_v24 = vmul.f32 1.442695, %v403_v23 }
 0x39b   :  { %840 = vpow2.f32 %v404_v24 }
 0x39c   :  { %842 = vtanh.f32 %v496_v26 }
 0x3a5   :  { %v841_v25 = vpop.eup %840 }
 0x3a6   :  { %719 = vmatmul.mubr.f32.vlgmr.msra.gmra.mrb[2].mxu1 %v841_v25  ;;  %v843_v30 = vpop.eup %842 }
 0x3a7   :  { %v498_v31 = vadd.f32 1.0, %v843_v30 }
 0x3a9   :  { %v499_v32 = vmul.f32 0.5, %v498_v31 }
 0x3ab   :  { %v506_v35 = vmul.f32 %v529_v0, %v499_v32 }
 0x479   :  { %v488_v27 = vpop.f32.mrb[2].mxu1 }
 0x47a   :  { %vm492_vm3 = vcmp.gt.f32.partialorder %v488_v27, 0.0  ;;  %v720_v28 = vpop.f32.mrb[3].mxu1 }
 0x47b   :  { %v493_v29 = vsel %vm492_vm3, %v488_v27, 1.0 }
 0x47c   :  { %844 = vrcp.f32 %v493_v29 }
 0x486   :  { %v845_v33 = vpop.eup %844 }
 0x487   :  { %v495_v34 = vmul.f32 %v845_v33, %v841_v25 }
 0x489   :  { %v507_v36 = vadd.f32 %v506_v35, %v495_v34 }
 0x48b   :  { %508 = vst [vmem:[#allocation10] sm:$0xff] %v507_v36 }
 0x48c   :  { %945 = shalt.err (!%p942_p8)
}
 0x48d   :  { %s946_s13 = scalar_lea.hbm %s1176_s10, 128 }
 0x48e   :  { %p947_p9 = scmp.ne.s32.totalorder %s1176_s10, %s946_s13  ;;  %p950_p10 = scmp.lt.u32.totalorder %s946_s13, %s1176_s10 }
 0x490   :  { %p952_p11 = pnand %p950_p10, %p947_p9 }
 0x492   :  { %955 = shalt.err (!%p952_p11)
}
 0x493   :  { %518 = dma.vmem_to_hbm [thread:$0]  %s516_s11, 128, %s1176_s10, [#allocation4]  }
 0x494   :  { %962 = dma.done.wait [#allocation4], 128  }
 0x495   :  { %963 = vsyncadd [#allocation4], 4294967168 }
 0x496   :  { %522 = vsyncpa [#allocation3], 1 }
 0x497   :  { %523 = vsyncpa [#allocation6], 1 }
 0x498   :  { %524 = vsyncpa [#allocation9], 1 }
 0x499   :  { %525 = vsyncpa [#allocation4], 1 }

</bundles_post_ra>
